<compile_context>
chip_gen: v7x
topology: tpu7x:2x2x1
jax: 0.10.0
libtpu: 0.0.40
codegen_flags: <defaults>
</compile_context>

<pallas_src>
import functools
import math

import jax
import jax.numpy as jnp
import numpy as np
from jax.experimental import pallas as pl
from jax.experimental.pallas import tpu as pltpu

_EPS = 1e-6
_NEG = -1e30


def _stower_kernel(x_ref, a_ref, nbr_ref, amp_ref, degm_ref,
                   wmean_ref, wmax_ref, bias_ref, o_ref, *, out_features):
    """One batch element: aggregate over nodes (all T at once), project."""
    x = x_ref[0]                 # (F, T*N)   lane-dense activations
    a_big = a_ref[...]           # (T*N, T*N) kron(eye(T), adj_norm.T)
    nbr_big = nbr_ref[...]       # (T*N, T*N) kron(eye(T), neighbor mask)
    amp = amp_ref[...]           # (1, T*N)   amplification scaler per column
    degm = degm_ref[...]         # (1, T*N)   1.0 where degree > 0
    w_mean = wmean_ref[...]      # (2*O, F)   [theta_mean_id.T ; theta_mean_amp.T]
    w_max = wmax_ref[...]        # (2*O, F)   [theta_max_id.T  ; theta_max_amp.T]
    bias = bias_ref[...]         # (O, 1)

    # ---- aggregator 1: weighted mean over neighbors (one MXU pass) ---------
    agg_mean = jnp.dot(x, a_big, preferred_element_type=jnp.float32)      # (F, T*N)

    # ---- aggregator 2: masked max over neighbors (fused where + lane max) --
    masked = jnp.where(nbr_big[None, :, :] > 0, x[:, None, :], _NEG)      # (F, T*N, T*N)
    agg_max = jnp.max(masked, axis=-1)                                    # (F, T*N)
    agg_max = jnp.where(degm > 0, agg_max, 0.0)

    # ---- projection with split theta; amplification applied post-matmul ----
    out_both = (jnp.dot(w_mean, agg_mean, preferred_element_type=jnp.float32)
                + jnp.dot(w_max, agg_max, preferred_element_type=jnp.float32))  # (2*O, T*N)
    out = out_both[:out_features] + amp * out_both[out_features:] + bias        # (O, T*N)
    o_ref[0] = out.astype(o_ref.dtype)


def stower_forward(X, adj, theta, bias, *, in_features, out_features):
    """X: (B, in_features, T, N) -> (B, out_features, T, N)."""
    B, F, T, N = X.shape
    assert F == in_features
    assert theta.shape == (4 * in_features, out_features)
    TN = T * N

    # Native-layout input; reshape is free (contiguous).
    x_fl = X.reshape(B, F, TN).astype(jnp.float32)                        # (B, F, T*N)

    # ---- adjacency-only precompute (hoisted out of the kernel) -------------
    adj_f = adj.astype(jnp.float32)
    nbr = (adj_f > 0).astype(jnp.float32)                                 # (N, N)
    w_deg = jnp.sum(adj_f, axis=1, keepdims=True)                         # (N, 1)
    deg = jnp.sum(nbr, axis=1, keepdims=True)                             # (N, 1)
    adj_norm = adj_f / (w_deg + _EPS)                                     # (N, N)
    log_d = jnp.log(deg + 1.0)
    delta = jnp.mean(log_d) + _EPS
    amp = (log_d / delta).reshape(N)                                      # (N,)

    eye_t = jnp.eye(T, dtype=jnp.float32)
    a_big = jnp.kron(eye_t, adj_norm.T)                                   # (T*N, T*N)
    nbr_big = jnp.kron(eye_t, nbr)                                        # (T*N, T*N)
    amp_tn = jnp.tile(amp, T).reshape(1, TN)                              # (1, T*N)
    degm_tn = jnp.tile((deg.reshape(N) > 0).astype(jnp.float32), T).reshape(1, TN)

    # ---- split theta: (mean|max) x (identity|amplification) ----------------
    th = theta.astype(jnp.float32)
    Fi = in_features
    w_mean = jnp.concatenate([th[0:Fi].T, th[2 * Fi:3 * Fi].T], axis=0)   # (2*O, F)
    w_max = jnp.concatenate([th[Fi:2 * Fi].T, th[3 * Fi:4 * Fi].T], axis=0)
    bias_col = bias.reshape(out_features, 1).astype(jnp.float32)          # (O, 1)

    kern = functools.partial(_stower_kernel, out_features=out_features)
    out = pl.pallas_call(
        kern,
        out_shape=jax.ShapeDtypeStruct((B, out_features, TN), jnp.float32),
        grid_spec=pltpu.PrefetchScalarGridSpec(
            num_scalar_prefetch=0,
            grid=(B,),
            in_specs=[
                pl.BlockSpec((1, F, TN), lambda b: (b, 0, 0)),
                pl.BlockSpec((TN, TN), lambda b: (0, 0)),
                pl.BlockSpec((TN, TN), lambda b: (0, 0)),
                pl.BlockSpec((1, TN), lambda b: (0, 0)),
                pl.BlockSpec((1, TN), lambda b: (0, 0)),
                pl.BlockSpec((2 * out_features, Fi), lambda b: (0, 0)),
                pl.BlockSpec((2 * out_features, Fi), lambda b: (0, 0)),
                pl.BlockSpec((out_features, 1), lambda b: (0, 0)),
            ],
            out_specs=pl.BlockSpec((1, out_features, TN), lambda b: (b, 0, 0)),
        ),
        compiler_params=pltpu.CompilerParams(
            dimension_semantics=("parallel",)),
    )(x_fl, a_big, nbr_big, amp_tn, degm_tn, w_mean, w_max, bias_col)

    # F.dropout(training=False) -> identity.  Free reshape, no transpose.
    return out.reshape(B, out_features, T, N)


def stower_reference(X, adj, theta, bias):
    """Pure-JAX reference mirroring the kernel semantics."""
    I = jnp.transpose(X, (0, 2, 3, 1)).astype(jnp.float32)                # (B, T, N, F)
    adj = adj.astype(jnp.float32)
    nbr = (adj > 0).astype(jnp.float32)
    w_deg = adj.sum(1, keepdims=True)                                     # (N, 1)
    deg = nbr.sum(1, keepdims=True)                                       # (N, 1)

    agg_mean = jnp.einsum('nm,btmf->btnf', adj, I) / (w_deg + _EPS)
    masked = jnp.where((adj > 0)[None, None, :, :, None],
                       I[:, :, None, :, :], _NEG)                        # (B,T,N,N,F)
    agg_max = masked.max(axis=3)
    agg_max = jnp.where(deg[None, None] > 0, agg_max, 0.0)

    m = jnp.concatenate([agg_mean, agg_max], axis=-1)
    log_d = jnp.log(deg + 1.0)
    delta = jnp.mean(log_d) + _EPS
    amp = (log_d / delta)[None, None]                                     # (1,1,N,1)
    m = jnp.concatenate([m, m * amp], axis=-1)

    out = jnp.einsum('btji,io->btjo', m, theta.astype(jnp.float32)) + bias
    return jnp.transpose(out, (0, 3, 1, 2))


if __name__ == "__main__":
    B, in_features, T, N = 2, 4, 8, 16
    out_features = 32
    aggregators = ["mean", "max"]
    scalers = ["identity", "amplification"]
    asf = len(aggregators) * len(scalers) * in_features                   # 16

    key = jax.random.PRNGKey(0)
    kx, kadj, ktheta, kbias = jax.random.split(key, 4)

    X = jax.random.normal(kx, (B, in_features, T, N), dtype=jnp.float32)

    raw = jax.random.uniform(kadj, (N, N), dtype=jnp.float32)
    adj = jnp.where(raw > 0.4, raw, 0.0)                                  # sparse weighted adjacency
    adj = adj * (1.0 - jnp.eye(N, dtype=jnp.float32))                     # no self-loops

    stdv_t = 1.0 / math.sqrt(out_features)
    theta = jax.random.uniform(ktheta, (asf, out_features),
                               minval=-stdv_t, maxval=stdv_t, dtype=jnp.float32)
    stdv_b = 1.0 / math.sqrt(out_features)
    bias = jax.random.uniform(kbias, (out_features,),
                              minval=-stdv_b, maxval=stdv_b, dtype=jnp.float32)

    out = stower_forward(X, adj, theta, bias,
                         in_features=in_features, out_features=out_features)
    out = jax.block_until_ready(out)

    ref = jax.block_until_ready(stower_reference(X, adj, theta, bias))
    assert out.shape == (B, out_features, T, N)
    np.testing.assert_allclose(np.asarray(out), np.asarray(ref),
                               rtol=1e-4, atol=1e-4)
    print("KERNEL_OK")
</pallas_src>

<mosaic_0001>
module attributes {stable_mosaic.version = 11 : i64} {
  func.func @_stower_kernel(%arg0: i32, %arg1: memref<1x4x128xf32, #tpu.memory_space<vmem>>, %arg2: memref<128x128xf32, #tpu.memory_space<vmem>>, %arg3: memref<128x128xf32, #tpu.memory_space<vmem>>, %arg4: memref<1x128xf32, #tpu.memory_space<vmem>>, %arg5: memref<1x128xf32, #tpu.memory_space<vmem>>, %arg6: memref<64x4xf32, #tpu.memory_space<vmem>>, %arg7: memref<64x4xf32, #tpu.memory_space<vmem>>, %arg8: memref<32x1xf32, #tpu.memory_space<vmem>>, %arg9: memref<1x32x128xf32, #tpu.memory_space<vmem>>) attributes {dimension_semantics = [#tpu.dimension_semantics<parallel>], iteration_bounds = array<i64: 2>, scalar_prefetch = 0 : i64, scratch_operands = 0 : i64, tpu.core_type = #tpu.core_type<tc>, window_params = [{transform_indices = @transform_0, window_bounds = array<i64: 1, 4, 128>}, {pipeline_mode = #tpu.pipeline_mode<synchronous>, transform_indices = @transform_1, window_bounds = array<i64: 128, 128>}, {pipeline_mode = #tpu.pipeline_mode<synchronous>, transform_indices = @transform_2, window_bounds = array<i64: 128, 128>}, {pipeline_mode = #tpu.pipeline_mode<synchronous>, transform_indices = @transform_3, window_bounds = array<i64: 1, 128>}, {pipeline_mode = #tpu.pipeline_mode<synchronous>, transform_indices = @transform_4, window_bounds = array<i64: 1, 128>}, {pipeline_mode = #tpu.pipeline_mode<synchronous>, transform_indices = @transform_5, window_bounds = array<i64: 64, 4>}, {pipeline_mode = #tpu.pipeline_mode<synchronous>, transform_indices = @transform_6, window_bounds = array<i64: 64, 4>}, {pipeline_mode = #tpu.pipeline_mode<synchronous>, transform_indices = @transform_7, window_bounds = array<i64: 32, 1>}, {transform_indices = @transform_8, window_bounds = array<i64: 1, 32, 128>}]} {
    %c0 = arith.constant 0 : index
    %c0_0 = arith.constant 0 : index
    %c0_1 = arith.constant 0 : index
    %0 = vector.load %arg1[%c0, %c0_0, %c0_1] : memref<1x4x128xf32, #tpu.memory_space<vmem>>, vector<1x4x128xf32>
    %1 = vector.shape_cast %0 : vector<1x4x128xf32> to vector<4x128xf32>
    %c0_2 = arith.constant 0 : index
    %c0_3 = arith.constant 0 : index
    %2 = vector.load %arg2[%c0_2, %c0_3] : memref<128x128xf32, #tpu.memory_space<vmem>>, vector<128x128xf32>
    %c0_4 = arith.constant 0 : index
    %c0_5 = arith.constant 0 : index
    %3 = vector.load %arg3[%c0_4, %c0_5] : memref<128x128xf32, #tpu.memory_space<vmem>>, vector<128x128xf32>
    %c0_6 = arith.constant 0 : index
    %c0_7 = arith.constant 0 : index
    %4 = vector.load %arg4[%c0_6, %c0_7] : memref<1x128xf32, #tpu.memory_space<vmem>>, vector<1x128xf32>
    %c0_8 = arith.constant 0 : index
    %c0_9 = arith.constant 0 : index
    %5 = vector.load %arg5[%c0_8, %c0_9] : memref<1x128xf32, #tpu.memory_space<vmem>>, vector<1x128xf32>
    %c0_10 = arith.constant 0 : index
    %c0_11 = arith.constant 0 : index
    %6 = vector.load %arg6[%c0_10, %c0_11] : memref<64x4xf32, #tpu.memory_space<vmem>>, vector<64x4xf32>
    %c0_12 = arith.constant 0 : index
    %c0_13 = arith.constant 0 : index
    %7 = vector.load %arg7[%c0_12, %c0_13] : memref<64x4xf32, #tpu.memory_space<vmem>>, vector<64x4xf32>
    %c0_14 = arith.constant 0 : index
    %c0_15 = arith.constant 0 : index
    %8 = vector.load %arg8[%c0_14, %c0_15] : memref<32x1xf32, #tpu.memory_space<vmem>>, vector<32x1xf32>
    %cst = arith.constant dense<0.000000e+00> : vector<4x128xf32>
    %9 = tpu.matmul %1, %2, %cst {dimension_numbers = #tpu.dot_dimension_numbers<[1], [0], [0], [1], [0, 0, 1, 1], [], []>} : vector<4x128xf32>, vector<128x128xf32>, vector<4x128xf32> -> vector<4x128xf32>
    %10 = vector.shape_cast %3 : vector<128x128xf32> to vector<1x128x128xf32>
    %cst_16 = arith.constant 0.000000e+00 : f32
    %11 = vector.broadcast %cst_16 : f32 to vector<1x128x128xf32>
    %12 = arith.cmpf ogt, %10, %11 : vector<1x128x128xf32>
    %13 = vector.shape_cast %1 : vector<4x128xf32> to vector<4x1x128xf32>
    %cst_17 = arith.constant -1.000000e+30 : f32
    %14 = vector.shape_cast %12 : vector<1x128x128xi1> to vector<1x128x128xi1>
    %15 = vector.broadcast %14 : vector<1x128x128xi1> to vector<4x128x128xi1>
    %16 = vector.shape_cast %13 : vector<4x1x128xf32> to vector<4x1x128xf32>
    %17 = vector.broadcast %16 : vector<4x1x128xf32> to vector<4x128x128xf32>
    %18 = vector.broadcast %cst_17 : f32 to vector<4x128x128xf32>
    %19 = arith.select %15, %17, %18 : vector<4x128x128xi1>, vector<4x128x128xf32>
    %cst_18 = arith.constant dense<0xFF800000> : vector<4x128xf32>
    %20 = vector.multi_reduction <maximumf>, %19, %cst_18 [2] : vector<4x128x128xf32> to vector<4x128xf32>
    %cst_19 = arith.constant 0.000000e+00 : f32
    %21 = vector.broadcast %cst_19 : f32 to vector<1x128xf32>
    %22 = arith.cmpf ogt, %5, %21 : vector<1x128xf32>
    %cst_20 = arith.constant 0.000000e+00 : f32
    %23 = vector.shape_cast %22 : vector<1x128xi1> to vector<1x128xi1>
    %24 = vector.broadcast %23 : vector<1x128xi1> to vector<4x128xi1>
    %25 = vector.broadcast %cst_20 : f32 to vector<4x128xf32>
    %26 = arith.select %24, %20, %25 : vector<4x128xi1>, vector<4x128xf32>
    %cst_21 = arith.constant dense<0.000000e+00> : vector<64x128xf32>
    %27 = tpu.matmul %6, %9, %cst_21 {dimension_numbers = #tpu.dot_dimension_numbers<[1], [0], [0], [1], [0, 0, 1, 1], [], []>} : vector<64x4xf32>, vector<4x128xf32>, vector<64x128xf32> -> vector<64x128xf32>
    %cst_22 = arith.constant dense<0.000000e+00> : vector<64x128xf32>
    %28 = tpu.matmul %7, %26, %cst_22 {dimension_numbers = #tpu.dot_dimension_numbers<[1], [0], [0], [1], [0, 0, 1, 1], [], []>} : vector<64x4xf32>, vector<4x128xf32>, vector<64x128xf32> -> vector<64x128xf32>
    %29 = arith.addf %27, %28 : vector<64x128xf32>
    %30 = vector.extract_strided_slice %29 {offsets = [0, 0], sizes = [32, 128], strides = [1, 1]} : vector<64x128xf32> to vector<32x128xf32>
    %31 = vector.extract_strided_slice %29 {offsets = [32, 0], sizes = [32, 128], strides = [1, 1]} : vector<64x128xf32> to vector<32x128xf32>
    %32 = vector.broadcast %4 : vector<1x128xf32> to vector<32x128xf32>
    %33 = arith.mulf %32, %31 : vector<32x128xf32>
    %34 = arith.addf %30, %33 : vector<32x128xf32>
    %35 = vector.broadcast %8 : vector<32x1xf32> to vector<32x128xf32>
    %36 = arith.addf %34, %35 : vector<32x128xf32>
    %c0_23 = arith.constant 0 : index
    %c0_24 = arith.constant 0 : index
    %c0_25 = arith.constant 0 : index
    %37 = vector.load %arg9[%c0_23, %c0_24, %c0_25] : memref<1x32x128xf32, #tpu.memory_space<vmem>>, vector<1x32x128xf32>
    %38 = vector.shape_cast %37 : vector<1x32x128xf32> to vector<32x128xf32>
    %39 = vector.shape_cast %36 : vector<32x128xf32> to vector<1x32x128xf32>
    tpu.vector_store %arg9[%c0_23, %c0_24, %c0_25], %39 {strides = array<i32>} : memref<1x32x128xf32, #tpu.memory_space<vmem>>, vector<1x32x128xf32>,
    return
  }
  func.func @transform_0(%arg0: i32) -> (i32, i32, i32) {
    %c0_i32 = arith.constant 0 : i32
    %c0_i32_0 = arith.constant 0 : i32
    %c0_i32_1 = arith.constant 0 : i32
    return %arg0, %c0_i32, %c0_i32_0 : i32, i32, i32
  }
  func.func @transform_1(%arg0: i32) -> (i32, i32) {
    %c0_i32 = arith.constant 0 : i32
    %c0_i32_0 = arith.constant 0 : i32
    %c0_i32_1 = arith.constant 0 : i32
    return %c0_i32, %c0_i32_0 : i32, i32
  }
  func.func @transform_2(%arg0: i32) -> (i32, i32) {
    %c0_i32 = arith.constant 0 : i32
    %c0_i32_0 = arith.constant 0 : i32
    %c0_i32_1 = arith.constant 0 : i32
    return %c0_i32, %c0_i32_0 : i32, i32
  }
  func.func @transform_3(%arg0: i32) -> (i32, i32) {
    %c0_i32 = arith.constant 0 : i32
    %c0_i32_0 = arith.constant 0 : i32
    %c0_i32_1 = arith.constant 0 : i32
    return %c0_i32, %c0_i32_0 : i32, i32
  }
  func.func @transform_4(%arg0: i32) -> (i32, i32) {
    %c0_i32 = arith.constant 0 : i32
    %c0_i32_0 = arith.constant 0 : i32
    %c0_i32_1 = arith.constant 0 : i32
    return %c0_i32, %c0_i32_0 : i32, i32
  }
  func.func @transform_5(%arg0: i32) -> (i32, i32) {
    %c0_i32 = arith.constant 0 : i32
    %c0_i32_0 = arith.constant 0 : i32
    %c0_i32_1 = arith.constant 0 : i32
    return %c0_i32, %c0_i32_0 : i32, i32
  }
  func.func @transform_6(%arg0: i32) -> (i32, i32) {
    %c0_i32 = arith.constant 0 : i32
    %c0_i32_0 = arith.constant 0 : i32
    %c0_i32_1 = arith.constant 0 : i32
    return %c0_i32, %c0_i32_0 : i32, i32
  }
  func.func @transform_7(%arg0: i32) -> (i32, i32) {
    %c0_i32 = arith.constant 0 : i32
    %c0_i32_0 = arith.constant 0 : i32
    %c0_i32_1 = arith.constant 0 : i32
    return %c0_i32, %c0_i32_0 : i32, i32
  }
  func.func @transform_8(%arg0: i32) -> (i32, i32, i32) {
    %c0_i32 = arith.constant 0 : i32
    %c0_i32_0 = arith.constant 0 : i32
    %c0_i32_1 = arith.constant 0 : i32
    return %arg0, %c0_i32, %c0_i32_0 : i32, i32, i32
  }
}

</mosaic_0001>

<bundles_post_ra>
// kernel: tpu_custom_call.1
= control target key start
LH: loop header
LB: loop body
LE: loop exit
PB: predicated region body
PF: predicated region fallthrough
CT: control target
= control target key end

     0   :  { %13 = vsyncpa [#allocation3], 0  ;;  %s2489_s0 = inlined_call_operand.vmem [shape: f32[2,4,128], index: 0, kind: input, shape index: {}]   ;;  %s2490_s1 = inlined_call_operand.vmem [shape: f32[128,128], index: 1, kind: input, shape index: {}]   ;;  %s2491_s2 = inlined_call_operand.hbm [shape: f32[128,128], index: 2, kind: input, shape index: {}]   ;;  %s2492_s3 = inlined_call_operand.vmem [shape: f32[1,128], index: 3, kind: input, shape index: {}]   ;;  %s2493_s4 = inlined_call_operand.vmem [shape: f32[1,128], index: 4, kind: input, shape index: {}]   ;;  %s2494_s5 = inlined_call_operand.vmem [shape: f32[64,4], index: 5, kind: input, shape index: {}]   ;;  %s2495_s6 = inlined_call_operand.vmem [shape: f32[64,4], index: 6, kind: input, shape index: {}]   ;;  %s2496_s7 = inlined_call_operand.vmem [shape: f32[32,1], index: 7, kind: input, shape index: {}]   ;;  %s2497_s8 = inlined_call_operand.hbm [shape: f32[2,32,128], index: 8, kind: output, shape index: {}]  }
   0x1   :  { %14 = vsyncpa [#allocation4], 0 }
   0x2   :  { %16 = vsyncpa [#allocation4 + $0x1], 0  ;;  %s1925_s27 = smov 0   ;;  %s1927_s28 = smov 0  }
   0x3   :  { %s1929_s29 = smov 0   ;;  %s1931_s30 = smov 0  }
   0x4 LB: > { %s1946_s9 = sadd.s32 4294967295, %s1867_s30   ;;  %s1549_s10 = sadd.s32 4294967294, %s1867_s30   ;;  %s1867_s30 = sphi %s1931_s30, %s2513_s30   ;;  %s1863_s29 = sphi %s1929_s29, %s2512_s29   ;;  %s1859_s28 = sphi %s1927_s28, %s2511_s28   ;;  %s1855_s27 = sphi %s1925_s27, %s2510_s27  }
   0x5   : > { %s1950_s11 = sadd.s32 1, %s1867_s30   ;;  %s202_s12 = sadd.s32 1, %s1863_s29 }
   0x6   : > { %s199_s13 = ssub.s32 %s1867_s30, %s1950_s11  ;;  %p212_p0 = scmp.ne.s32.totalorder %s1863_s29, %s1859_s28 }
   0x7   : > { %p200_p1 = scmp.eq.s32.totalorder %s199_s13, 0  ;;  %p213_p2 = scmp.eq.s32.totalorder %s1946_s9, 1 }
   0x8   : > { %p218_p3 = scmp.ne.s32.totalorder %s1859_s28, %s1855_s27  ;;  %p219_p4 = scmp.eq.s32.totalorder %s1549_s10, 1 }
   0x9   : > { %s1961_s14 = scalar_select %p200_p1, %s1863_s29, %s202_s12  }
   0xa   : > { %p1963_p5 = por %p213_p2, %p212_p0  ;;  %p1967_p6 = por %p219_p4, %p218_p3 }
   0xb   : > { %p1550_p7 = scmp.ge.s32.totalorder %s1867_s30, 1  ;;  %p226_p8 = scmp.lt.s32.totalorder %s1867_s30, 3 }
   0xc   : > { %s2501_s15 = scalar_select %p1963_p5, 1, 0 }
   0xd   : > { %s2502_s16 = scalar_select %p1967_p6, 1, 0 }
   0xe   : > { %p2498_p9 = scmp.eq.s32.totalorder %s1946_s9, 0  ;;  %p1974_p10 = pnand %p1550_p7, %p226_p8 }
   0xf   : > { %s1869_s18 = smov [#allocation2]   ;;  %s1773_s23 = scalar_lea.hbm %s2491_s2, 2048 }
  0x10   : > { %s2503_s17 = scalar_select %p1974_p10, 1, 0 }
  0x11   : > { %s241_s19 = sshll.u32 %s1869_s18, 4  ;;  %p1718_p11 = pneg %p1974_p10  ;;  %s242_s19 = int_to_ptr.vmem [resolvable:$true] %s241_s19 }
  0x12   : > { %p1774_p13 = scmp.ne.s32.totalorder %s2491_s2, %s1773_s23  ;;  %p1780_p3 = scmp.lt.u32.totalorder %s1773_s23, %s2491_s2 }
  0x13   : > { %p1982_p12 = pnand %p2498_p9, %p1718_p11 }
  0x15   : > { %p1775_p0 = pneg %p1982_p12 }
  0x17   : > { %p1776_p1 = pnand %p1775_p0, %p1774_p13 }
  0x19   : > { %p1777_p2 = pneg %p1776_p1 }
  0x1b   : > { %p1782_p4 = pnand %p1780_p3, %p1777_p2 }
  0x1d   : > { %1785 = shalt.err (!%p1782_p4)
}
  0x1e   : > { %s1786_s12 = scalar_lea.vmem %s242_s19, 2048  ;;  %p1794_p9 = scmp.lt.s32.totalorder %s242_s19, %s242_s19 }
  0x1f   : > { %p1787_p7 = scmp.ne.s32.totalorder %s242_s19, %s1786_s12  ;;  %p1795_p6 = scmp.lt.s32.totalorder %s1786_s12, %s1786_s12 }
  0x21   : > { %p1789_p8 = pnand %p1787_p7, %p1775_p0  ;;  %p1796_p5 = por %p1795_p6, %p1794_p9 }
  0x23   : > { %p1790_p11 = pneg %p1789_p8 }
  0x25   : > { %p1797_p10 = pnand %p1796_p5, %p1790_p11 }
  0x27   : > { %1800 = shalt.err (!%p1797_p10)
}
  0x28   : > { %s1870_s13 = smov 128   ;;  %s1871_s18 = smov 8  }
  0x29   : > { %1721 = dma.hbm_to_vmem [thread:$0]  (!%p1982_p12), %s2491_s2, 2048, %s242_s19, [#allocation3], %s1870_s13, %s1870_s13, %s1871_s18  }
  0x2a   : > { %p2505_p13 = scmp.ne.s32.totalorder %s2503_s17, 0 }
  0x2b   : > { %p2506_p1 = scmp.eq.s32.totalorder (!%p2505_p13), %s1946_s9, 0 }
  0x2c   : > { %279 = sbr.rel (%p2505_p13) target bundleno = 603 (0x25b), region = 52 }
  0x33   : > { %1846 = dma.done.wait (%p2506_p1), [#allocation3], 2048   ;;  %p2507_p0 = pmov %p2506_p1 }
  0x34   : > { %p312_p5 = scmp.lt.s32.totalorder %s1946_s9, 1  ;;  %v461_v0 = vlaneseq  ;;  %v1872_v1 = vmov 1966171168   ;;  %v1873_v3 = vmov 0.0|0.0   ;;  %vm1874_vm0 = vmmov 0   ;;  %v2020_v9 = vld [vmem:[#allocation2] sm:$0xff] }
  0x35   : > { %1848 = vsyncadd (%p2507_p0), [#allocation3], 4294965248  ;;  %v459_v2 = vunpack.c.l.s4 %v1872_v1  ;;  %1680 = vmatprep.subr.bf16.mxu0 %v1873_v3  ;;  %v1875_v5 = vmov 0.0   ;;  %v317_v12 = vld [vmem:[%s2490_s1] sm:$0xff]  ;;  %v318_v13 = vld [vmem:[%s2490_s1 + $0x8] sm:$0xff]  ;;  %vm441_vm1 = vcmp.gt.f32.partialorder %v2020_v9, 0.0 }
  0x36   : > { %s313_s20 = scalar_select %p312_p5, %s1946_s9, 1  ;;  %v2012_v4 = vshrl.u32 %v461_v0, 7  ;;  %1649 = vmatprep.mubr.msk.f32.mxu0 %vm1874_vm0, %v1875_v5  ;;  %v2032_v16 = vld [vmem:[#allocation2 + $0x8] sm:$0xff]  ;;  %v1681_v17 = vpack.c.bf16 %v318_v13, %v317_v12  ;;  %v319_v18 = vld [vmem:[%s2490_s1 + $0x10] sm:$0xff]  ;;  %v320_v19 = vld [vmem:[%s2490_s1 + $0x18] sm:$0xff] }
  0x37   : > { %v460_v6 = vunpack.c.0.s8 %v459_v2  ;;  %v1684_v22 = vpack.c.bf16 %v320_v19, %v319_v18  ;;  %vm442_vm2 = vcmp.gt.f32.partialorder %v2032_v16, 0.0  ;;  %v321_v23 = vld [vmem:[%s2490_s1 + $0x20] sm:$0xff]  ;;  %v322_v24 = vld [vmem:[%s2490_s1 + $0x28] sm:$0xff]  ;;  %v2058_v27 = vld [vmem:[#allocation2 + $0x10] sm:$0xff]  ;;  %s1581_s10 = sshll.u32 %s1946_s9, 9  ;;  %p2508_p9 = scmp.ne.s32.totalorder %s2501_s15, 0 }
  0x38   : > { %s1556_s17 = sshll.u32 %s313_s20, 2  ;;  %v2024_v11 = vsub.s32 0, %v2012_v4  ;;  %1682 = vmatpush3.bf16.msra.mxu0 %v1681_v17  ;;  %v1687_v30 = vpack.c.bf16 %v322_v24, %v321_v23  ;;  %vm443_vm3 = vcmp.gt.f32.partialorder %v2058_v27, 0.0  ;;  %v323_v31 = vld [vmem:[%s2490_s1 + $0x30] sm:$0xff]  ;;  %v324_v32 = vld [vmem:[%s2490_s1 + $0x38] sm:$0xff]  ;;  %v325_v38 = vld [vmem:[%s2490_s1 + $0x40] sm:$0xff]  ;;  %s2444_s18 = scalar_lea.hbm %s2497_s8, %s1581_s10 }
  0x39   : > { %s315_s24 = scalar_lea.vmem %s2489_s0, %s1556_s17  ;;  %v463_v7 = vsub.s32 %v460_v6, %v2012_v4  ;;  %1683 = vmatprep.subr.bf16.mxu0 %v1873_v3  ;;  %v2077_v34 = vld [vmem:[#allocation2 + $0x18] sm:$0xff]  ;;  %v1690_v37 = vpack.c.bf16 %v324_v32, %v323_v31  ;;  %v326_v39 = vld [vmem:[%s2490_s1 + $0x48] sm:$0xff]  ;;  %v327_v44 = vld [vmem:[%s2490_s1 + $0x50] sm:$0xff]  ;;  %s309_s17 = sand.u32 1, %s1859_s28  }
  0x3a   : > { %v2018_v8 = vld [vmem:[%s315_s24] sm:$0xf]  ;;  %vm444_vm4 = vcmp.gt.f32.partialorder %v2077_v34, 0.0  ;;  %v1693_v43 = vpack.c.bf16 %v326_v39, %v325_v38  ;;  %v328_v45 = vld [vmem:[%s2490_s1 + $0x58] sm:$0xff]  ;;  %v330_v51 = vld [vmem:[%s2490_s1 + $0x68] sm:$0xff]  ;;  %s1555_s24 = sshll.u32 %s309_s17, 5 }
  0x3b   : > { %v464_v10 = vrot.slane %v2018_v8, %v463_v7  ;;  %v1696_v49 = vpack.c.bf16 %v328_v45, %v327_v44  ;;  %v329_v50 = vld [vmem:[%s2490_s1 + $0x60] sm:$0xff]  ;;  %v331_v57 = vld [vmem:[%s2490_s1 + $0x70] sm:$0xff]  ;;  %v332_v58 = vld [vmem:[%s2490_s1 + $0x78] sm:$0xff]  ;;  %s311_s25 = scalar_lea.vmem [#allocation5], %s1555_s24  ;;  %s2448_s9 = scalar_lea.sflag [#allocation4], %s309_s17 }
  0x3c   : > { %1685 = vmatpush3.bf16.msra.mxu0 %v1684_v22  ;;  %v337_v55 = vld [vmem:[#allocation2 + $0x20] sm:$0xff]  ;;  %v1699_v56 = vpack.c.bf16 %v330_v51, %v329_v50  ;;  %v1702_v61 = vpack.c.bf16 %v332_v58, %v331_v57  ;;  %v338_v1 = vld [vmem:[#allocation2 + $0x28] sm:$0xff]  ;;  %v340_v13 = vld [vmem:[#allocation2 + $0x38] sm:$0xff]  ;;  %s1475_s26 = sshll.u32 %s311_s25, 4  ;;  %s1877_s22 = smov [#allocation5]   ;;  %s2439_s26 = int_to_ptr.vmem [resolvable:$true] %s1475_s26 }
  0x3d   : > { %v472_v14 = vrot.slane %v464_v10, %v463_v7  ;;  %v465_v15 = vcombine.high %v464_v10, %v464_v10  ;;  %1686 = vmatprep.subr.bf16.mxu0 %v1873_v3  ;;  %vm445_vm5 = vcmp.gt.f32.partialorder %v337_v55, 0.0  ;;  %vm446_vm6 = vcmp.gt.f32.partialorder %v338_v1, 0.0  ;;  %v341_v18 = vld [vmem:[#allocation2 + $0x40] sm:$0xff]  ;;  %v342_v24 = vld [vmem:[#allocation2 + $0x48] sm:$0xff]  ;;  %v347_v51 = vld [vmem:[#allocation2 + $0x70] sm:$0xff]  ;;  %s1801_s21 = scalar_lea.vmem %s2439_s26, 512 }
  0x3e   : > { %vm448_vm8 = vcmp.gt.f32.partialorder %v340_v13, 0.0  ;;  %vm449_vm9 = vcmp.gt.f32.partialorder %v341_v18, 0.0  ;;  %vm450_vm10 = vcmp.gt.f32.partialorder %v342_v24, 0.0  ;;  %vm455_vm15 = vcmp.gt.f32.partialorder %v347_v51, 0.0  ;;  %v348_v57 = vld [vmem:[#allocation2 + $0x78] sm:$0xff]  ;;  %p1802_p6 = scmp.ne.s32.totalorder %s2439_s26, %s1801_s21  ;;  %s1805_s20 = sshll.u32 %s1877_s22, 4  ;;  %s1806_s20 = int_to_ptr.vmem [resolvable:$false] %s1805_s20 }
  0x3f   : > { %v2042_v20 = vrot.slane %v472_v14, %v2024_v11  ;;  %v479_v21 = vrot.slane %v465_v15, %v463_v7  ;;  %v480_v35 = vcombine.high %v472_v14, %v472_v14  ;;  %v339_v7 = vld [vmem:[#allocation2 + $0x30] sm:$0xff]  ;;  %vm456_vm0 = vcmp.gt.f32.partialorder %v348_v57, 0.0  ;;  %s1807_s19 = scalar_lea.vmem %s1806_s20, 1024  ;;  %p1808_p2 = scmp.lt.s32.totalorder %s2439_s26, %s1806_s20 }
  0x40   : > { %1688 = vmatpush3.bf16.msra.mxu0 %v1687_v30  ;;  %vm447_vm7 = vcmp.gt.f32.partialorder %v339_v7, 0.0  ;;  %v343_v30 = vld [vmem:[#allocation2 + $0x50] sm:$0xff]  ;;  %p1803_p10 = pnand %p1802_p6, %p2508_p9  ;;  %p1809_p3 = scmp.lt.s32.totalorder %s1807_s19, %s1801_s21 }
  0x41   : > { %v534_v25 = vsel %vm441_vm1, %v2042_v20, -1e+30  ;;  %v2056_v26 = vrot.slane %v479_v21, %v2024_v11  ;;  %v535_v29 = vsel %vm442_vm2, %v2042_v20, -1e+30  ;;  %v536_v36 = vsel %vm443_vm3, %v2042_v20, -1e+30  ;;  %1689 = vmatprep.subr.bf16.mxu0 %v1873_v3 }
  0x42   : > { %598 = vmax.xlane.f32.xlu0 %v534_v25  ;;  %v2094_v41 = vrot.slane %v480_v35, %v2024_v11  ;;  %v537_v42 = vsel %vm444_vm4, %v2042_v20, -1e+30  ;;  %v481_v47 = vcombine.high %v479_v21, %v479_v21  ;;  %v538_v62 = vsel %vm445_vm5, %v2042_v20, -1e+30  ;;  %v344_v35 = vld [vmem:[#allocation2 + $0x58] sm:$0xff]  ;;  %p1804_p12 = pneg %p1803_p10  ;;  %p1810_p4 = por %p1809_p3, %p1808_p2 }
  0x43   : > { %v550_v28 = vsel %vm441_vm1, %v2056_v26, -1e+30  ;;  %v551_v33 = vsel %vm442_vm2, %v2056_v26, -1e+30  ;;  %v552_v40 = vsel %vm443_vm3, %v2056_v26, -1e+30 }
  0x44   : > { %630 = vmax.xlane.f32.xlu1 %v550_v28  ;;  %1691 = vmatpush3.bf16.msra.mxu0 %v1690_v37  ;;  %v567_v46 = vsel %vm442_vm2, %v2094_v41, -1e+30  ;;  %v566_v48 = vsel %vm441_vm1, %v2094_v41, -1e+30  ;;  %v553_v52 = vsel %vm444_vm4, %v2056_v26, -1e+30  ;;  %v2123_v53 = vrot.slane %v481_v47, %v2024_v11  ;;  %p1811_p7 = pnand %p1810_p4, %p1804_p12 }
  0x45   : > { %1692 = vmatprep.subr.bf16.mxu0 %v1873_v3  ;;  %v568_v54 = vsel %vm443_vm3, %v2094_v41, -1e+30  ;;  %v554_v63 = vsel %vm445_vm5, %v2056_v26, -1e+30  ;;  %v569_v2 = vsel %vm444_vm4, %v2094_v41, -1e+30 }
  0x46   : > { %600 = vmax.xlane.f32.xlu0 %v535_v29  ;;  %v582_v59 = vsel %vm441_vm1, %v2123_v53, -1e+30  ;;  %v583_v60 = vsel %vm442_vm2, %v2123_v53, -1e+30  ;;  %v539_v5 = vsel %vm446_vm6, %v2042_v20, -1e+30 }
  0x47   : > { %v555_v6 = vsel %vm446_vm6, %v2056_v26, -1e+30  ;;  %v570_v9 = vsel %vm445_vm5, %v2094_v41, -1e+30  ;;  %v540_v10 = vsel %vm447_vm7, %v2042_v20, -1e+30 }
  0x48   : > { %632 = vmax.xlane.f32.xlu1 %v551_v33  ;;  %1694 = vmatpush3.bf16.msra.mxu0 %v1693_v43  ;;  %v556_v12 = vsel %vm447_vm7, %v2056_v26, -1e+30  ;;  %v571_v14 = vsel %vm446_vm6, %v2094_v41, -1e+30  ;;  %v586_v15 = vsel %vm445_vm5, %v2123_v53, -1e+30 }
  0x49   : > { %1695 = vmatprep.subr.bf16.mxu0 %v1873_v3  ;;  %v541_v16 = vsel %vm448_vm8, %v2042_v20, -1e+30  ;;  %v557_v17 = vsel %vm448_vm8, %v2056_v26, -1e+30  ;;  %v572_v19 = vsel %vm447_vm7, %v2094_v41, -1e+30 }
  0x4a   : > { %602 = vmax.xlane.f32.xlu0 %v536_v36  ;;  %v587_v21 = vsel %vm446_vm6, %v2123_v53, -1e+30  ;;  %v542_v22 = vsel %vm449_vm9, %v2042_v20, -1e+30  ;;  %v558_v23 = vsel %vm449_vm9, %v2056_v26, -1e+30 }
  0x4b   : > { %v573_v25 = vsel %vm448_vm8, %v2094_v41, -1e+30  ;;  %v588_v27 = vsel %vm447_vm7, %v2123_v53, -1e+30  ;;  %v543_v28 = vsel %vm450_vm10, %v2042_v20, -1e+30 }
  0x4c   : > { %634 = vmax.xlane.f32.xlu1 %v552_v40  ;;  %1697 = vmatpush3.bf16.msra.mxu0 %v1696_v49  ;;  %v559_v29 = vsel %vm450_vm10, %v2056_v26, -1e+30  ;;  %v574_v31 = vsel %vm449_vm9, %v2094_v41, -1e+30  ;;  %vm451_vm11 = vcmp.gt.f32.partialorder %v343_v30, 0.0  ;;  %vm452_vm12 = vcmp.gt.f32.partialorder %v344_v35, 0.0 }
  0x4d   : > { %1698 = vmatprep.subr.bf16.mxu0 %v1873_v3  ;;  %v589_v32 = vsel %vm448_vm8, %v2123_v53, -1e+30  ;;  %v544_v33 = vsel %vm451_vm11, %v2042_v20, -1e+30  ;;  %v560_v34 = vsel %vm451_vm11, %v2056_v26, -1e+30 }
  0x4e   : > { %604 = vmax.xlane.f32.xlu0 %v537_v42  ;;  %v575_v36 = vsel %vm450_vm10, %v2094_v41, -1e+30  ;;  %v590_v37 = vsel %vm449_vm9, %v2123_v53, -1e+30  ;;  %v545_v38 = vsel %vm452_vm12, %v2042_v20, -1e+30 }
  0x4f   : > { %v561_v39 = vsel %vm452_vm12, %v2056_v26, -1e+30  ;;  %v345_v40 = vld [vmem:[#allocation2 + $0x60] sm:$0xff]  ;;  %v576_v42 = vsel %vm451_vm11, %v2094_v41, -1e+30  ;;  %vm808_vm1 = vcmask 130112  }
  0x50   : > { %664 = vmax.xlane.f32.xlu1 %v567_v46  ;;  %1700 = vmatpush3.bf16.msra.mxu0 %v1699_v56  ;;  %vm453_vm13 = vcmp.gt.f32.partialorder %v345_v40, 0.0  ;;  %v591_v43 = vsel %vm450_vm10, %v2123_v53, -1e+30  ;;  %v346_v46 = vld [vmem:[#allocation2 + $0x68] sm:$0xff]  ;;  %v577_v47 = vsel %vm452_vm12, %v2094_v41, -1e+30 }
  0x51   : > { %1701 = vmatprep.subr.bf16.mxu0 %v1873_v3  ;;  %v584_v3 = vsel %vm443_vm3, %v2123_v53, -1e+30  ;;  %v546_v44 = vsel %vm453_vm13, %v2042_v20, -1e+30  ;;  %v562_v45 = vsel %vm453_vm13, %v2056_v26, -1e+30 }
  0x52   : > { %662 = vmax.xlane.f32.xlu0 %v566_v48  ;;  %vm454_vm14 = vcmp.gt.f32.partialorder %v346_v46, 0.0  ;;  %v592_v48 = vsel %vm451_vm11, %v2123_v53, -1e+30  ;;  %v548_v55 = vsel %vm455_vm15, %v2042_v20, -1e+30  ;;  %vm1153_vm2 = vcmask 31744  }
  0x53   : > { %v547_v49 = vsel %vm454_vm14, %v2042_v20, -1e+30  ;;  %v563_v50 = vsel %vm454_vm14, %v2056_v26, -1e+30  ;;  %v564_v56 = vsel %vm455_vm15, %v2056_v26, -1e+30 }
  0x54   : > { %636 = vmax.xlane.f32.xlu1 %v553_v52  ;;  %1703 = vmatpush3.bf16.msra.mxu0 %v1702_v61  ;;  %v578_v52 = vsel %vm453_vm13, %v2094_v41, -1e+30  ;;  %v579_v58 = vsel %vm454_vm14, %v2094_v41, -1e+30  ;;  %v565_v61 = vsel %vm456_vm0, %v2056_v26, -1e+30 }
  0x55   : > { %v581_v1 = vsel %vm456_vm0, %v2094_v41, -1e+30  ;;  %v2245_v26 = vand.u32 127, %v461_v0  ;;  %vm815_vm3 = vcmask 195712   ;;  %vm829_vm5 = vcmask 326912  }
  0x56   : > { %666 = vmax.xlane.f32.xlu0 %v568_v54  ;;  %v593_v54 = vsel %vm452_vm12, %v2123_v53, -1e+30  ;;  %vm836_vm6 = vcmask 392512   ;;  %vm843_vm7 = vcmask 458112   ;;  %vm850_vm8 = vcmask 523712  }
  0x57   : > { %1650 = vmatmul.mubr.f32.vlgmr.msra.gmra.mrb[0].mxu0 %v2018_v8  ;;  %v585_v8 = vsel %vm444_vm4, %v2123_v53, -1e+30  ;;  %vm822_vm4 = vcmask 261312   ;;  %vm857_vm9 = vcmask 589312   ;;  %vm864_vm10 = vcmask 654912  }
  0x58   : > { %694 = vmax.xlane.f32.xlu1 %v582_v59  ;;  %v594_v59 = vsel %vm453_vm13, %v2123_v53, -1e+30  ;;  %vm871_vm11 = vcmask 720512   ;;  %vm878_vm12 = vcmask 786112   ;;  %vm885_vm13 = vcmask 851712  }
  0x5a   : > { %696 = vmax.xlane.f32.xlu0 %v583_v60  ;;  %v549_v60 = vsel %vm456_vm0, %v2042_v20, -1e+30  ;;  %v597_v20 = vsel %vm456_vm0, %v2123_v53, -1e+30  ;;  %vm906_vm0 = vcmask 1048512  }
  0x5c   : > { %606 = vmax.xlane.f32.xlu1 %v538_v62  ;;  %v580_v62 = vsel %vm455_vm15, %v2094_v41, -1e+30 }
  0x5e   : > { %638 = vmax.xlane.f32.xlu0 %v554_v63  ;;  %v595_v63 = vsel %vm454_vm14, %v2123_v53, -1e+30  ;;  %vm892_vm14 = vcmask 917312  }
  0x60   : > { %668 = vmax.xlane.f32.xlu1 %v569_v2  ;;  %v596_v2 = vsel %vm455_vm15, %v2123_v53, -1e+30  ;;  %v810_v53 = vadd.s32 4294967280, %v2245_v26  ;;  %vm899_vm15 = vcmask 982912  }
  0x62   : > { %698 = vmax.xlane.f32.xlu0 %v584_v3  ;;  %v801_v3 = vsub.s32 %v2245_v26, %v2012_v4 }
  0x64   : > { %608 = vmax.xlane.f32.xlu1 %v539_v5  ;;  %v803_v5 = vadd.s32 4294967288, %v2245_v26 }
  0x66   : > { %640 = vmax.xlane.f32.xlu0 %v555_v6  ;;  %v1876_v6 = vmov 0  }
  0x67   : > { %1772 = vset.pattern.permute.xlu1 %v1876_v6  ;;  %1771 = vset.pattern.permute.xlu0 %v1876_v6 }
  0x68   : > { %670 = vmax.xlane.f32.xlu1 %v570_v9  ;;  %v806_v9 = vsub.s32 %v803_v5, %v2012_v4 }
  0x6a   : > { %700 = vmax.xlane.f32.xlu0 %v585_v8 }
  0x6c   : > { %610 = vmax.xlane.f32.xlu1 %v540_v10 }
  0x6e   : > { %642 = vmax.xlane.f32.xlu0 %v556_v12  ;;  %v359_v12 = vld [vmem:[%s2495_s6] sm:$0xff] }
  0x6f   : > { %1654 = vmatprep.mubr.msk.f32.mxu1 %vm1153_vm2, %v359_v12 }
  0x70   : > { %672 = vmax.xlane.f32.xlu1 %v571_v14  ;;  %v813_v14 = vsub.s32 %v810_v53, %v2012_v4  ;;  %v369_v53 = vld [vmem:[%s2496_s7 + $0x10] sm:$0xff] }
  0x72   : > { %702 = vmax.xlane.f32.xlu0 %v586_v15  ;;  %v817_v15 = vadd.s32 4294967272, %v2245_v26 }
  0x74   : > { %612 = vmax.xlane.f32.xlu1 %v541_v16 }
  0x76   : > { %644 = vmax.xlane.f32.xlu0 %v557_v17 }
  0x78   : > { %674 = vmax.xlane.f32.xlu1 %v572_v19 }
  0x7a   : > { %704 = vmax.xlane.f32.xlu0 %v587_v21 }
  0x7c   : > { %614 = vmax.xlane.f32.xlu1 %v542_v22 }
  0x7e   : > { %646 = vmax.xlane.f32.xlu0 %v558_v23  ;;  %v2263_v23 = vsub.s32 %v817_v15, %v2012_v4 }
  0x80   : > { %676 = vmax.xlane.f32.xlu1 %v573_v25 }
  0x82   : > { %706 = vmax.xlane.f32.xlu0 %v588_v27 }
  0x84   : > { %616 = vmax.xlane.f32.xlu1 %v543_v28 }
  0x86   : > { %648 = vmax.xlane.f32.xlu0 %v559_v29 }
  0x88   : > { %678 = vmax.xlane.f32.xlu1 %v574_v31 }
  0x8a   : > { %708 = vmax.xlane.f32.xlu0 %v589_v32 }
  0x8c   : > { %618 = vmax.xlane.f32.xlu1 %v544_v33 }
  0x8e   : > { %650 = vmax.xlane.f32.xlu0 %v560_v34 }
  0x90   : > { %680 = vmax.xlane.f32.xlu1 %v575_v36 }
  0x92   : > { %710 = vmax.xlane.f32.xlu0 %v590_v37 }
  0x94   : > { %620 = vmax.xlane.f32.xlu1 %v545_v38 }
  0x96   : > { %652 = vmax.xlane.f32.xlu0 %v561_v39  ;;  %v824_v39 = vadd.s32 4294967264, %v2245_v26 }
  0x98   : > { %682 = vmax.xlane.f32.xlu1 %v576_v42 }
  0x9a   : > { %712 = vmax.xlane.f32.xlu0 %v591_v43 }
  0x9c   : > { %622 = vmax.xlane.f32.xlu1 %v546_v44 }
  0x9e   : > { %654 = vmax.xlane.f32.xlu0 %v562_v45 }
  0xa0   : > { %684 = vmax.xlane.f32.xlu1 %v577_v47  ;;  %v827_v47 = vsub.s32 %v824_v39, %v2012_v4 }
  0xa2   : > { %714 = vmax.xlane.f32.xlu0 %v592_v48 }
  0xa4   : > { %624 = vmax.xlane.f32.xlu1 %v547_v49 }
  0xa6   : > { %656 = vmax.xlane.f32.xlu0 %v563_v50 }
  0xa8   : > { %686 = vmax.xlane.f32.xlu1 %v578_v52 }
  0xaa   : > { %716 = vmax.xlane.f32.xlu0 %v593_v54  ;;  %v831_v54 = vadd.s32 4294967256, %v2245_v26 }
  0xac   : > { %626 = vmax.xlane.f32.xlu1 %v548_v55 }
  0xae   : > { %658 = vmax.xlane.f32.xlu0 %v564_v56 }
  0xb0   : > { %688 = vmax.xlane.f32.xlu1 %v579_v58 }
  0xb2   : > { %718 = vmax.xlane.f32.xlu0 %v594_v59 }
  0xb4   : > { %628 = vmax.xlane.f32.xlu1 %v549_v60 }
  0xb6   : > { %660 = vmax.xlane.f32.xlu0 %v565_v61  ;;  %v834_v61 = vsub.s32 %v831_v54, %v2012_v4  ;;  %v859_v54 = vadd.s32 4294967224, %v2245_v26 }
  0xb8   : > { %690 = vmax.xlane.f32.xlu1 %v580_v62 }
  0xba   : > { %720 = vmax.xlane.f32.xlu0 %v595_v63 }
  0xbc   : > { %692 = vmax.xlane.f32.xlu1 %v581_v1 }
  0xbe   : > { %722 = vmax.xlane.f32.xlu0 %v596_v2 }
  0xc0   : > { %724 = vmax.xlane.f32.xlu1 %v597_v20  ;;  %v368_v20 = vld [vmem:[%s2496_s7 + $0x8] sm:$0xff] }
  0xcf   : > { %v599_v41 = vpop.xlane.xlu0 %598 }
  0xd0   : > { %v802_v7 = vrot.slane %v599_v41, %v801_v3  ;;  %v838_v41 = vadd.s32 4294967248, %v2245_v26 }
  0xd1   : > { %v631_v8 = vpop.xlane.xlu1 %630  ;;  %1440 = vperm.xlu1 %1772, %v368_v20  }
  0xd2   : > { %v911_v10 = vrot.slane %v631_v8, %v801_v3 }
  0xd3   : > { %v601_v0 = vpop.xlane.xlu0 %600 }
  0xd4   : > { %v807_v13 = vrot.slane %v601_v0, %v806_v9 }
  0xd5   : > { %v633_v16 = vpop.xlane.xlu1 %632  ;;  %1445 = vperm.xlu1 %1772, %v369_v53  }
  0xd6   : > { %v809_v17 = vsel %vm808_vm1, %v807_v13, %v802_v7  ;;  %v915_v18 = vrot.slane %v633_v16, %v806_v9  ;;  %v367_v7 = vld [vmem:[%s2496_s7] sm:$0xff]  ;;  %v370_v16 = vld [vmem:[%s2496_s7 + $0x18] sm:$0xff] }
  0xd7   : > { %v603_v19 = vpop.xlane.xlu0 %602  ;;  %1435 = vperm.xlu0 %1771, %v367_v7  }
  0xd8   : > { %v916_v21 = vsel %vm808_vm1, %v915_v18, %v911_v10  ;;  %v814_v22 = vrot.slane %v603_v19, %v813_v14 }
  0xd9   : > { %v635_v24 = vpop.xlane.xlu1 %634  ;;  %1450 = vperm.xlu1 %1772, %v370_v16  }
  0xda   : > { %v816_v25 = vsel %vm815_vm3, %v814_v22, %v809_v17  ;;  %v920_v27 = vrot.slane %v635_v24, %v813_v14  ;;  %v845_v24 = vadd.s32 4294967240, %v2245_v26 }
  0xdb   : > { %v605_v28 = vpop.xlane.xlu0 %604 }
  0xdc   : > { %v921_v29 = vsel %vm815_vm3, %v920_v27, %v916_v21  ;;  %v821_v30 = vrot.slane %v605_v28, %v2263_v23 }
  0xdd   : > { %v665_v31 = vpop.xlane.xlu1 %664 }
  0xde   : > { %v823_v32 = vsel %vm822_vm4, %v821_v30, %v816_v25  ;;  %v994_v33 = vrot.slane %v665_v31, %v806_v9 }
  0xdf   : > { %v663_v34 = vpop.xlane.xlu0 %662 }
  0xe0   : > { %v990_v35 = vrot.slane %v663_v34, %v801_v3 }
  0xe1   : > { %v637_v36 = vpop.xlane.xlu1 %636 }
  0xe2   : > { %v995_v37 = vsel %vm808_vm1, %v994_v33, %v990_v35  ;;  %v925_v38 = vrot.slane %v637_v36, %v2263_v23 }
  0xe3   : > { %v667_v40 = vpop.xlane.xlu0 %666 }
  0xe4   : > { %v926_v42 = vsel %vm822_vm4, %v925_v38, %v921_v29  ;;  %v999_v43 = vrot.slane %v667_v40, %v813_v14  ;;  %v852_v38 = vadd.s32 4294967232, %v2245_v26 }
  0xe5   : > { %v695_v44 = vpop.xlane.xlu1 %694 }
  0xe6   : > { %v1000_v45 = vsel %vm815_vm3, %v999_v43, %v995_v37  ;;  %v1069_v46 = vrot.slane %v695_v44, %v801_v3 }
  0xe7   : > { %v697_v48 = vpop.xlane.xlu0 %696 }
  0xe8   : > { %v1073_v49 = vrot.slane %v697_v48, %v806_v9 }
  0xe9   : > { %v607_v50 = vpop.xlane.xlu1 %606 }
  0xea   : > { %v1074_v51 = vsel %vm808_vm1, %v1073_v49, %v1069_v46  ;;  %v828_v52 = vrot.slane %v607_v50, %v827_v47  ;;  %v855_v46 = vsub.s32 %v852_v38, %v2012_v4  ;;  %vm1145_vm1 = vcmask 1041409  }
  0xeb   : > { %v639_v55 = vpop.xlane.xlu0 %638 }
  0xec   : > { %v830_v56 = vsel %vm829_vm5, %v828_v52, %v823_v32  ;;  %v930_v57 = vrot.slane %v639_v55, %v827_v47  ;;  %v848_v32 = vsub.s32 %v845_v24, %v2012_v4 }
  0xed   : > { %v669_v58 = vpop.xlane.xlu1 %668 }
  0xee   : > { %v931_v59 = vsel %vm829_vm5, %v930_v57, %v926_v42  ;;  %v1004_v60 = vrot.slane %v669_v58, %v2263_v23 }
  0xef   : > { %v699_v62 = vpop.xlane.xlu0 %698 }
  0xf0   : > { %v1005_v63 = vsel %vm822_vm4, %v1004_v60, %v1000_v45  ;;  %v1078_v1 = vrot.slane %v699_v62, %v813_v14  ;;  %v841_v14 = vsub.s32 %v838_v41, %v2012_v4  ;;  %v862_v62 = vsub.s32 %v859_v54, %v2012_v4 }
  0xf1   : > { %v609_v2 = vpop.xlane.xlu1 %608 }
  0xf2   : > { %v1079_v3 = vsel %vm815_vm3, %v1078_v1, %v1074_v51  ;;  %v835_v5 = vrot.slane %v609_v2, %v834_v61 }
  0xf3   : > { %v641_v9 = vpop.xlane.xlu0 %640 }
  0xf4   : > { %v837_v8 = vsel %vm836_vm6, %v835_v5, %v830_v56  ;;  %v935_v10 = vrot.slane %v641_v9, %v834_v61  ;;  %v866_v5 = vadd.s32 4294967216, %v2245_v26 }
  0xf5   : > { %v671_v0 = vpop.xlane.xlu1 %670 }
  0xf6   : > { %v936_v12 = vsel %vm836_vm6, %v935_v10, %v931_v59  ;;  %v1009_v13 = vrot.slane %v671_v0, %v827_v47  ;;  %v869_v0 = vsub.s32 %v866_v5, %v2012_v4 }
  0xf7   : > { %v701_v15 = vpop.xlane.xlu0 %700 }
  0xf8   : > { %v1010_v17 = vsel %vm829_vm5, %v1009_v13, %v1005_v63  ;;  %v1083_v18 = vrot.slane %v701_v15, %v2263_v23 }
  0xf9   : > { %v611_v19 = vpop.xlane.xlu1 %610 }
  0xfa   : > { %v1084_v21 = vsel %vm822_vm4, %v1083_v18, %v1079_v3  ;;  %v842_v22 = vrot.slane %v611_v19, %v841_v14  ;;  %v873_v18 = vadd.s32 4294967208, %v2245_v26  ;;  %vm1147_vm4 = vcmask 1042434  }
  0xfb   : > { %v643_v25 = vpop.xlane.xlu0 %642 }
  0xfc   : > { %v844_v27 = vsel %vm843_vm7, %v842_v22, %v837_v8  ;;  %v940_v28 = vrot.slane %v643_v25, %v841_v14 }
  0xfd   : > { %v673_v29 = vpop.xlane.xlu1 %672 }
  0xfe   : > { %v941_v30 = vsel %vm843_vm7, %v940_v28, %v936_v12  ;;  %v1014_v31 = vrot.slane %v673_v29, %v834_v61  ;;  %v876_v28 = vsub.s32 %v873_v18, %v2012_v4 }
  0xff   : > { %v703_v33 = vpop.xlane.xlu0 %702 }
 0x100   : > { %v1015_v23 = vsel %vm836_vm6, %v1014_v31, %v1010_v17  ;;  %v1088_v34 = vrot.slane %v703_v33, %v827_v47 }
 0x101   : > { %v613_v35 = vpop.xlane.xlu1 %612 }
 0x102   : > { %v1089_v36 = vsel %vm829_vm5, %v1088_v34, %v1084_v21  ;;  %v849_v37 = vrot.slane %v613_v35, %v848_v32  ;;  %v880_v34 = vadd.s32 4294967200, %v2245_v26  ;;  %vm1149_vm5 = vcmask 1043459  }
 0x103   : > { %v645_v39 = vpop.xlane.xlu0 %644 }
 0x104   : > { %v851_v40 = vsel %vm850_vm8, %v849_v37, %v844_v27  ;;  %v945_v42 = vrot.slane %v645_v39, %v848_v32 }
 0x105   : > { %v675_v43 = vpop.xlane.xlu1 %674 }
 0x106   : > { %v946_v44 = vsel %vm850_vm8, %v945_v42, %v941_v30  ;;  %v1019_v45 = vrot.slane %v675_v43, %v841_v14  ;;  %v883_v42 = vsub.s32 %v880_v34, %v2012_v4 }
 0x107   : > { %v705_v48 = vpop.xlane.xlu0 %704 }
 0x108   : > { %v1020_v47 = vsel %vm843_vm7, %v1019_v45, %v1015_v23  ;;  %v1093_v49 = vrot.slane %v705_v48, %v834_v61 }
 0x109   : > { %v615_v50 = vpop.xlane.xlu1 %614 }
 0x10a   : > { %v1094_v51 = vsel %vm836_vm6, %v1093_v49, %v1089_v36  ;;  %v856_v52 = vrot.slane %v615_v50, %v855_v46  ;;  %v887_v49 = vadd.s32 4294967192, %v2245_v26 }
 0x10b   : > { %v647_v55 = vpop.xlane.xlu0 %646 }
 0x10c   : > { %v858_v56 = vsel %vm857_vm9, %v856_v52, %v851_v40  ;;  %v950_v57 = vrot.slane %v647_v55, %v855_v46 }
 0x10d   : > { %v677_v58 = vpop.xlane.xlu1 %676 }
 0x10e   : > { %v951_v59 = vsel %vm857_vm9, %v950_v57, %v946_v44  ;;  %v1024_v60 = vrot.slane %v677_v58, %v848_v32  ;;  %v890_v57 = vsub.s32 %v887_v49, %v2012_v4 }
 0x10f   : > { %v707_v63 = vpop.xlane.xlu0 %706 }
 0x110   : > { %v1025_v61 = vsel %vm850_vm8, %v1024_v60, %v1020_v47  ;;  %v1098_v1 = vrot.slane %v707_v63, %v841_v14 }
 0x111   : > { %v617_v2 = vpop.xlane.xlu1 %616 }
 0x112   : > { %v1099_v20 = vsel %vm843_vm7, %v1098_v1, %v1094_v51  ;;  %v863_v3 = vrot.slane %v617_v2, %v862_v62  ;;  %v894_v2 = vadd.s32 4294967184, %v2245_v26  ;;  %vm1178_vm7 = vcmask 1043456  }
 0x113   : > { %v649_v41 = vpop.xlane.xlu0 %648 }
 0x114   : > { %v865_v7 = vsel %vm864_vm10, %v863_v3, %v858_v56  ;;  %v955_v9 = vrot.slane %v649_v41, %v862_v62 }
 0x115   : > { %v679_v53 = vpop.xlane.xlu1 %678 }
 0x116   : > { %v956_v8 = vsel %vm864_vm10, %v955_v9, %v951_v59  ;;  %v1029_v10 = vrot.slane %v679_v53, %v855_v46 }
 0x117   : > { %v709_v12 = vpop.xlane.xlu0 %708 }
 0x118   : > { %v1030_v13 = vsel %vm857_vm9, %v1029_v10, %v1025_v61  ;;  %v1103_v14 = vrot.slane %v709_v12, %v848_v32 }
 0x119   : > { %v619_v15 = vpop.xlane.xlu1 %618 }
 0x11a   : > { %v1104_v16 = vsel %vm850_vm8, %v1103_v14, %v1099_v20  ;;  %v870_v17 = vrot.slane %v619_v15, %v869_v0 }
 0x11b   : > { %v651_v19 = vpop.xlane.xlu0 %650 }
 0x11c   : > { %v872_v21 = vsel %vm871_vm11, %v870_v17, %v865_v7  ;;  %v960_v22 = vrot.slane %v651_v19, %v869_v0 }
 0x11d   : > { %v681_v24 = vpop.xlane.xlu1 %680 }
 0x11e   : > { %v961_v25 = vsel %vm871_vm11, %v960_v22, %v956_v8  ;;  %v1034_v27 = vrot.slane %v681_v24, %v862_v62  ;;  %v897_v8 = vsub.s32 %v894_v2, %v2012_v4  ;;  %v353_v2 = vld [vmem:[%s2494_s5 + $0x10] sm:$0xff] }
 0x11f   : > { %v711_v29 = vpop.xlane.xlu0 %710 }
 0x120   : > { %v1035_v30 = vsel %vm864_vm10, %v1034_v27, %v1030_v13  ;;  %v1108_v31 = vrot.slane %v711_v29, %v855_v46 }
 0x121   : > { %v621_v32 = vpop.xlane.xlu1 %620 }
 0x122   : > { %v1109_v33 = vsel %vm857_vm9, %v1108_v31, %v1104_v16  ;;  %v877_v23 = vrot.slane %v621_v32, %v876_v28  ;;  %v901_v16 = vadd.s32 4294967176, %v2245_v26  ;;  %v350_v26 = vld [vmem:[%s2493_s4] sm:$0x1] }
 0x123   : > { %v653_v35 = vpop.xlane.xlu0 %652  ;;  %vm726_vm3 = vcmp.gt.f32.partialorder %v350_v26, 0.0 }
 0x124   : > { %v879_v36 = vsel %vm878_vm12, %v877_v23, %v872_v21  ;;  %v965_v37 = vrot.slane %v653_v35, %v876_v28 }
 0x125   : > { %v683_v38 = vpop.xlane.xlu1 %682 }
 0x126   : > { %v966_v39 = vsel %vm878_vm12, %v965_v37, %v961_v25  ;;  %v1039_v40 = vrot.slane %v683_v38, %v869_v0  ;;  %v904_v25 = vsub.s32 %v901_v16, %v2012_v4 }
 0x127   : > { %v713_v43 = vpop.xlane.xlu0 %712 }
 0x128   : > { %v1040_v44 = vsel %vm871_vm11, %v1039_v40, %v1035_v30  ;;  %v1113_v45 = vrot.slane %v713_v43, %v862_v62 }
 0x129   : > { %v623_v46 = vpop.xlane.xlu1 %622 }
 0x12a   : > { %v1114_v48 = vsel %vm864_vm10, %v1113_v45, %v1109_v33  ;;  %v884_v47 = vrot.slane %v623_v46, %v883_v42  ;;  %v2343_v63 = vpop.f32.mrb[0].mxu0 }
 0x12b   : > { %v655_v50 = vpop.xlane.xlu0 %654  ;;  %v1651_v20 = vpop.f32.mrb[1].mxu0 }
 0x12c   : > { %v886_v51 = vsel %vm885_vm13, %v884_v47, %v879_v36  ;;  %v970_v52 = vrot.slane %v655_v50, %v883_v42  ;;  %v354_v20 = vld [vmem:[%s2494_s5 + $0x18] sm:$0xff] }
 0x12d   : > { %v685_v54 = vpop.xlane.xlu1 %684 }
 0x12e   : > { %v971_v55 = vsel %vm885_vm13, %v970_v52, %v966_v39  ;;  %v1044_v56 = vrot.slane %v685_v54, %v876_v28 }
 0x12f   : > { %v715_v58 = vpop.xlane.xlu0 %714 }
 0x130   : > { %v1045_v59 = vsel %vm878_vm12, %v1044_v56, %v1040_v44  ;;  %v1118_v60 = vrot.slane %v715_v58, %v869_v0  ;;  %v362_v58 = vld [vmem:[%s2495_s6 + $0x18] sm:$0xff] }
 0x131   : > { %v625_v62 = vpop.xlane.xlu1 %624 }
 0x132   : > { %v1119_v61 = vsel %vm871_vm11, %v1118_v60, %v1114_v48  ;;  %v891_v1 = vrot.slane %v625_v62, %v890_v57  ;;  %v364_v60 = vld [vmem:[%s2495_s6 + $0x28] sm:$0xff]  ;;  %v365_v62 = vld [vmem:[%s2495_s6 + $0x30] sm:$0xff] }
 0x133   : > { %v657_v3 = vpop.xlane.xlu0 %656 }
 0x134   : > { %v893_v5 = vsel %vm892_vm14, %v891_v1, %v886_v51  ;;  %v975_v41 = vrot.slane %v657_v3, %v890_v57  ;;  %v352_v1 = vld [vmem:[%s2494_s5 + $0x8] sm:$0xff]  ;;  %v355_v3 = vld [vmem:[%s2494_s5 + $0x20] sm:$0xff] }
 0x135   : > { %v687_v7 = vpop.xlane.xlu1 %686 }
 0x136   : > { %v976_v9 = vsel %vm892_vm14, %v975_v41, %v971_v55  ;;  %v1049_v53 = vrot.slane %v687_v7, %v883_v42  ;;  %v357_v41 = vld [vmem:[%s2494_s5 + $0x30] sm:$0xff]  ;;  %v358_v7 = vld [vmem:[%s2494_s5 + $0x38] sm:$0xff] }
 0x137   : > { %v717_v10 = vpop.xlane.xlu0 %716 }
 0x138   : > { %v1050_v0 = vsel %vm885_vm13, %v1049_v53, %v1045_v59  ;;  %v1123_v12 = vrot.slane %v717_v10, %v876_v28  ;;  %v363_v59 = vld [vmem:[%s2495_s6 + $0x20] sm:$0xff] }
 0x139   : > { %v627_v13 = vpop.xlane.xlu1 %626 }
 0x13a   : > { %v1124_v14 = vsel %vm878_vm12, %v1123_v12, %v1119_v61  ;;  %v898_v15 = vrot.slane %v627_v13, %v897_v8  ;;  %v351_v61 = vld [vmem:[%s2494_s5] sm:$0xff] }
 0x13b   : > { %v659_v17 = vpop.xlane.xlu0 %658  ;;  %v1575_v12 = vld [vmem:[%s2492_s3] ss:$0 sm:$0xff] }
 0x13c   : > { %v900_v18 = vsel %vm899_vm15, %v898_v15, %v893_v5  ;;  %v980_v19 = vrot.slane %v659_v17, %v897_v8  ;;  %v356_v5 = vld [vmem:[%s2494_s5 + $0x28] sm:$0xff] }
 0x13d   : > { %v689_v21 = vpop.xlane.xlu1 %688 }
 0x13e   : > { %v981_v22 = vsel %vm899_vm15, %v980_v19, %v976_v9  ;;  %v1054_v24 = vrot.slane %v689_v21, %v890_v57 }
 0x13f   : > { %v719_v27 = vpop.xlane.xlu0 %718 }
 0x140   : > { %v1055_v28 = vsel %vm892_vm14, %v1054_v24, %v1050_v0  ;;  %v1128_v29 = vrot.slane %v719_v27, %v883_v42  ;;  %v727_v42 = vsel %vm726_vm3, 1, %v1876_v6 }
 0x141   : > { %v629_v30 = vpop.xlane.xlu1 %628  ;;  %v731_v48 = vrot.slane %v727_v42, %v2024_v11  ;;  %v361_v11 = vld [vmem:[%s2495_s6 + $0x10] sm:$0xff] }
 0x142   : > { %v1129_v31 = vsel %vm885_vm13, %v1128_v29, %v1124_v14  ;;  %v905_v32 = vrot.slane %v629_v30, %v904_v25 }
 0x143   : > { %v661_v33 = vpop.xlane.xlu0 %660  ;;  %vm732_vm6 = vcmp.eq.s32.totalorder %v731_v48, 1 }
 0x144   : > { %v907_v23 = vsel %vm906_vm0, %v905_v32, %v900_v18  ;;  %v985_v34 = vrot.slane %v661_v33, %v904_v25 }
 0x145   : > { %v691_v35 = vpop.xlane.xlu1 %690 }
 0x146   : > { %v986_v4 = vsel %vm906_vm0, %v985_v34, %v981_v22  ;;  %v1059_v36 = vrot.slane %v691_v35, %v897_v8 }
 0x147   : > { %v721_v37 = vpop.xlane.xlu0 %720  ;;  %v1146_v38 = vsel %vm1145_vm1, %v986_v4, %v907_v23 }
 0x148   : > { %v1060_v39 = vsel %vm899_vm15, %v1059_v36, %v1055_v28  ;;  %v1133_v40 = vrot.slane %v721_v37, %v890_v57  ;;  %v360_v57 = vld [vmem:[%s2495_s6 + $0x8] sm:$0xff] }
 0x149   : > { %v693_v43 = vpop.xlane.xlu1 %692 }
 0x14a   : > { %v1134_v44 = vsel %vm892_vm14, %v1133_v40, %v1129_v31  ;;  %v1064_v45 = vrot.slane %v693_v43, %v904_v25 }
 0x14b   : > { %v723_v46 = vpop.xlane.xlu0 %722 }
 0x14c   : > { %v1065_v47 = vsel %vm906_vm0, %v1064_v45, %v1060_v39  ;;  %v1138_v49 = vrot.slane %v723_v46, %v897_v8 }
 0x14d   : > { %v725_v50 = vpop.xlane.xlu1 %724  ;;  %v1148_v51 = vsel %vm1147_vm4, %v1065_v47, %v1146_v38 }
 0x14e   : > { %v1139_v52 = vsel %vm899_vm15, %v1138_v49, %v1134_v44  ;;  %v1143_v54 = vrot.slane %v725_v50, %v904_v25 }
 0x150   : > { %v1144_v6 = vsel %vm906_vm0, %v1143_v54, %v1139_v52 }
 0x151   : > { %v1150_v55 = vsel %vm1149_vm5, %v1144_v6, %v1148_v51  ;;  %v1441_v8 = vpop.permute.xlu1 %1440 }
 0x152   : > { %v1152_v56 = vsel %vm732_vm6, %v1150_v55, 0.0 }
 0x153   : > { %1652 = vmatprep.subr.msk.mxu1 %vm1178_vm7, %v1152_v56 }
 0x154   : > { %1653 = vmatpush3.msk.msra.mxu1 %vm1178_vm7, %v1152_v56 }
 0x155   : > { %1655 = vmatmul.mubr.msk.f32.vlgmr.msra.gmra.mrb[0].mxu1 %vm1153_vm2, %v360_v57  ;;  %1666 = vmatprep.subr.msk.mxu1 %vm1178_vm7, %v2343_v63  ;;  %v1446_v16 = vpop.permute.xlu1 %1445 }
 0x156   : > { %1667 = vmatpush3.msk.msra.mxu1 %vm1178_vm7, %v2343_v63  ;;  %1657 = vmatprep.mubr.msk.f32.mxu1 %vm1153_vm2, %v361_v11  ;;  %v366_v63 = vld [vmem:[%s2495_s6 + $0x38] sm:$0xff]  ;;  %v1436_v19 = vpop.permute.xlu0 %1435 }
 0x159   : > { %1658 = vmatmul.mubr.msk.f32.gmra.mrb[2].mxu1 %vm1153_vm2, %v362_v58  ;;  %v1451_v31 = vpop.permute.xlu1 %1450 }
 0x15a   : > { %1660 = vmatprep.mubr.msk.f32.mxu1 %vm1153_vm2, %v363_v59 }
 0x15d   : > { %1661 = vmatmul.mubr.msk.f32.gmra.mrb[4].mxu1 %vm1153_vm2, %v364_v60 }
 0x15e   : > { %1663 = vmatprep.mubr.msk.f32.mxu1 %vm1153_vm2, %v365_v62 }
 0x161   : > { %1664 = vmatmul.mubr.msk.f32.gmra.mrb[6].mxu1 %vm1153_vm2, %v366_v63 }
 0x162   : > { %1668 = vmatprep.mubr.msk.f32.mxu1 %vm1153_vm2, %v351_v61 }
 0x165   : > { %1669 = vmatmul.mubr.msk.f32.vlgmr.msra.gmra.mrb[0].mxu1 %vm1153_vm2, %v352_v1 }
 0x166   : > { %1671 = vmatprep.mubr.msk.f32.mxu1 %vm1153_vm2, %v353_v2 }
 0x169   : > { %1672 = vmatmul.mubr.msk.f32.gmra.mrb[2].mxu1 %vm1153_vm2, %v354_v20 }
 0x16a   : > { %1674 = vmatprep.mubr.msk.f32.mxu1 %vm1153_vm2, %v355_v3 }
 0x16d   : > { %1675 = vmatmul.mubr.msk.f32.gmra.mrb[4].mxu1 %vm1153_vm2, %v356_v5 }
 0x16e   : > { %1677 = vmatprep.mubr.msk.f32.mxu1 %vm1153_vm2, %v357_v41 }
 0x171   : > { %1678 = vmatmul.mubr.msk.f32.gmra.mrb[6].mxu1 %vm1153_vm2, %v358_v7 }
 0x238   : > { %v1670_v9 = vpop.f32.mrb[0].mxu1 }
 0x239   : > { %v1380_v53 = vpop.f32.mrb[1].mxu1 }
 0x23c   : > { %v1673_v10 = vpop.f32.mrb[2].mxu1 }
 0x23d   : > { %v1390_v0 = vpop.f32.mrb[3].mxu1 }
 0x240   : > { %v1676_v13 = vpop.f32.mrb[4].mxu1 }
 0x241   : > { %v1426_v14 = vmul.f32 %v1676_v13, %v1575_v12  ;;  %v1400_v15 = vpop.f32.mrb[5].mxu1 }
 0x242   : > { %v1425_v17 = vmul.f32 %v1575_v12, %v1400_v15 }
 0x243   : > { %v1430_v18 = vadd.f32 %v1670_v9, %v1426_v14 }
 0x244   : > { %v1679_v21 = vpop.f32.mrb[6].mxu1  ;;  %v1429_v22 = vadd.f32 %v1425_v17, %v1380_v53 }
 0x245   : > { %v1454_v24 = vadd.f32 %v1441_v8, %v1430_v18  ;;  %v1428_v25 = vmul.f32 %v1679_v21, %v1575_v12  ;;  %v1410_v27 = vpop.f32.mrb[7].mxu1 }
 0x246   : > { %v1453_v28 = vadd.f32 %v1436_v19, %v1429_v22  ;;  %v1427_v29 = vmul.f32 %v1575_v12, %v1410_v27 }
 0x247   : > { %1458 = vst [vmem:[%s311_s25 + $0x8] sm:$0xff] %v1454_v24  ;;  %v1432_v30 = vadd.f32 %v1673_v10, %v1428_v25 }
 0x248   : > { %1457 = vst [vmem:[%s311_s25] sm:$0xff] %v1453_v28  ;;  %v1431_v32 = vadd.f32 %v1427_v29, %v1390_v0 }
 0x249   : > { %v1456_v26 = vadd.f32 %v1451_v31, %v1432_v30 }
 0x24a   : > { %v1455_v33 = vadd.f32 %v1446_v16, %v1431_v32 }
 0x24b   : > { %1460 = vst [vmem:[%s311_s25 + $0x18] sm:$0xff] %v1456_v26 }
 0x24c   : > { %1459 = vst [vmem:[%s311_s25 + $0x10] sm:$0xff] %v1455_v33 }
 0x24d   : > { %1814 = shalt.err (!%p1811_p7)
}
 0x24e   : > { %s1815_s17 = scalar_lea.hbm %s2444_s18, 512  ;;  %s1819_s25 = scalar_lea.hbm %s2497_s8, 1024 }
 0x24f   : > { %p1816_p8 = scmp.ne.s32.totalorder %s2444_s18, %s1815_s17  ;;  %p1820_p1 = scmp.lt.u32.totalorder %s2444_s18, %s2497_s8 }
 0x250   : > { %p1821_p0 = scmp.lt.u32.totalorder %s1819_s25, %s1815_s17  ;;  %p1823_p6 = scmp.lt.u32.totalorder %s1815_s17, %s2444_s18 }
 0x251   : > { %p1817_p11 = pnand %p1816_p8, %p2508_p9 }
 0x252   : > { %p1822_p5 = por %p1821_p0, %p1820_p1 }
 0x253   : > { %p1818_p13 = pneg %p1817_p11 }
 0x254   : > { %p1824_p10 = por %p1823_p6, %p1822_p5 }
 0x256   : > { %p1825_p12 = pnand %p1824_p10, %p1818_p13 }
 0x258   : > { %1828 = shalt.err (!%p1825_p12)
}
 0x259   : > { %s1878_s13 = smov 128   ;;  %s1879_s21 = smov 8  }
 0x25a   : > { %1716 = dma.vmem_to_hbm [thread:$0]  (%p2508_p9), %s2439_s26, 512, %s2444_s18, %s2448_s9, %s1878_s13, %s1878_s13, %s1879_s21  }
 0x25b PF: > { %p1728_p2 = scmp.ge.s32.totalorder %s1867_s30, 2  ;;  %s1490_s22 = sand.u32 1, %s1855_s27  }
 0x25c   : > { %p2509_p3 = scmp.ne.s32.totalorder %s2502_s16, 0  ;;  %s1491_s20 = scalar_lea.sflag [#allocation4], %s1490_s22 }
 0x25e   : > { %p1723_p4 = pnand %p1728_p2, %p2509_p3 }
 0x260   : > { %1850 = dma.done.wait (!%p1723_p4), %s1491_s20, 512  }
 0x261   : > { %1852 = vsyncadd (!%p1723_p4), %s1491_s20, 4294966784  ;;  %p19_p7 = scmp.ge.s32.totalorder %s1950_s11, 4   ;;  %s2510_s27 = smov %s1859_s28 }
 0x262   : > { %s2511_s28 = smov %s1863_s29  ;;  %s2512_s29 = smov %s1961_s14 }
 0x263   : > { %s2513_s30 = smov %s1950_s11  ;;  %21 = sbr.rel (!%p19_p7) target bundleno = 4 (0x4), region = 92 }
 0x26a   :  { %1496 = vsyncpa [#allocation3], 1 }
 0x26b   :  { %1498 = vsyncpa [#allocation3 + $0x1], 1 }
 0x26c   :  { %1499 = vsyncpa [#allocation4], 1 }
 0x26d   :  { %1501 = vsyncpa [#allocation4 + $0x1], 1 }

</bundles_post_ra>
